<compile_context>
chip_gen: v7x
topology: tpu7x:2x2x1
jax: 0.10.0
libtpu: 0.0.40
codegen_flags: <defaults>
</compile_context>

<pallas_src>
import jax
import jax.numpy as jnp
from jax.experimental import pallas as pl
from jax.experimental.pallas import tpu as pltpu

C_IN, C_MID, C_OUT = 64, 64, 256
BN_EPS = 1e-5
LANE = 128


# --------------------------------------------------------------------------- #
# Kernel
# --------------------------------------------------------------------------- #
def _fused_kernel(x_ref, w_ref, b_ref, o_ref):
    # x_ref: (1, C_IN, T)           w_ref: (C_OUT, C_IN) bf16
    # b_ref: (C_OUT, 1) f32         o_ref: (1, C_OUT, T) out_dtype (bf16 default)
    x = x_ref[0]
    if x.dtype != jnp.bfloat16:
        x = x.astype(jnp.bfloat16)           # in-kernel cast: no extra HBM pass
    # bf16 x bf16 -> f32 accumulate on the MXU; per-column independence means
    # garbage in the masked (ragged) lanes never contaminates valid columns.
    acc = jnp.dot(w_ref[...], x, preferred_element_type=jnp.float32)   # (C_OUT, T)
    o_ref[0] = (acc + b_ref[...]).astype(o_ref.dtype)


def _pick_hw_tile(hw, n_batch, target=2048, min_steps=4):
    """Fixed 128-aligned lane tile; ragged last tile is masked by Pallas.

    Shrinks the tile until there are at least `min_steps` grid steps so the
    DMA pipeline has work to overlap and v7x megacore can use both cores.
    """
    target = max(LANE, (target // LANE) * LANE)
    t = min(((hw + LANE - 1) // LANE) * LANE, target)
    while t > LANE and n_batch * pl.cdiv(hw, t) < min_steps:
        t = max(LANE, (t // 2 // LANE) * LANE)
    return t


def shallow_resnet_forward(x_nchw, folded, *, target_tile=2048,
                           out_dtype=jnp.bfloat16, min_steps=4):
    N, C, H, W = x_nchw.shape
    assert C == C_IN, f"expected {C_IN} input channels, got {C}"
    hw = H * W
    x = x_nchw.reshape(N, C_IN, hw)              # pure view, no copy (NCHW-native)

    t = _pick_hw_tile(hw, N, target_tile, min_steps)
    grid = (N, pl.cdiv(hw, t))

    x_isz = jnp.dtype(x_nchw.dtype).itemsize
    o_isz = jnp.dtype(out_dtype).itemsize

    # Per-step VMEM: double-buffered x and out tiles + resident constants.
    per_step = 2 * (C_IN * t * x_isz + C_OUT * t * o_isz) \
        + 2 * (C_OUT * C_IN * 2 + C_OUT * 4)
    vmem_limit = None
    if per_step > 12 * 1024 * 1024:              # only raise when tiles are big
        vmem_limit = int(min(per_step + (2 << 20), 48 * 1024 * 1024))

    cost = pl.CostEstimate(
        flops=2 * N * C_OUT * C_IN * hw,
        transcendentals=0,
        bytes_accessed=N * hw * (C_IN * x_isz + C_OUT * o_isz)
        + C_OUT * C_IN * 2 + C_OUT * 4,
    )

    out = pl.pallas_call(
        _fused_kernel,
        out_shape=jax.ShapeDtypeStruct((N, C_OUT, hw), out_dtype),
        grid=grid,
        in_specs=[
            pl.BlockSpec((1, C_IN, t), lambda n, j: (n, 0, j)),    # x tile
            pl.BlockSpec((C_OUT, C_IN), lambda n, j: (0, 0)),      # folded W^T (bf16)
            pl.BlockSpec((C_OUT, 1), lambda n, j: (0, 0)),         # folded bias (f32)
        ],
        out_specs=pl.BlockSpec((1, C_OUT, t), lambda n, j: (n, 0, j)),
        compiler_params=pltpu.CompilerParams(
            dimension_semantics=("parallel", "parallel"),
            vmem_limit_bytes=vmem_limit),
        cost_estimate=cost,
    )(x, folded["w_ft"], folded["b_f"])

    return out.reshape(N, C_OUT, H, W)           # pure view, no copy


# --------------------------------------------------------------------------- #
# Parameters: raw (PyTorch-layout) params, fold, and f32 reference
# --------------------------------------------------------------------------- #
def init_raw_params(key):
    """Random params in PyTorch layout: conv weight (C_out, C_in), BN running stats."""
    ks = jax.random.split(key, 10)
    w1 = 0.05 * jax.random.normal(ks[0], (C_MID, C_IN), jnp.float32)   # conv1 weight
    w2 = 0.05 * jax.random.normal(ks[1], (C_OUT, C_MID), jnp.float32)  # conv3 weight

    def bn_fold(kg, kb, km, kv, c):
        gamma = 1.0 + 0.1 * jax.random.normal(kg, (c,), jnp.float32)
        beta = 0.1 * jax.random.normal(kb, (c,), jnp.float32)
        mean = 0.1 * jax.random.normal(km, (c,), jnp.float32)
        var = jnp.abs(jax.random.normal(kv, (c,), jnp.float32)) + 0.5
        scale = gamma / jnp.sqrt(var + BN_EPS)        # eval-mode BN -> affine
        bias = beta - mean * scale
        return scale, bias

    s1, b1 = bn_fold(ks[2], ks[3], ks[4], ks[5], C_MID)
    s2, b2 = bn_fold(ks[6], ks[7], ks[8], ks[9], C_OUT)
    return {"w1": w1, "w2": w2, "s1": s1, "b1": b1, "s2": s2, "b2": b2}


def fold_params(p):
    """Collapse conv1+bn1+conv3+bn3 into one affine map (exact: no ReLU)."""
    w1s = p["w1"] * p["s1"][:, None]                 # diag(s1) @ W1   (64, 64)
    w2s = p["w2"] * p["s2"][:, None]                 # diag(s2) @ W2   (256, 64)
    w_ft = w2s @ w1s                                 # (256, 64)
    b_f = w2s @ p["b1"] + p["b2"]                    # (256,)
    return {"w_ft": w_ft.astype(jnp.bfloat16),
            "b_f": b_f.reshape(C_OUT, 1).astype(jnp.float32)}


def reference_forward(x_nchw, p):
    """Unfused f32 reference: conv1 -> bn1 -> conv3 -> bn3 (eval-mode BN)."""
    N, C, H, W = x_nchw.shape
    xf = x_nchw.reshape(N, C, H * W)
    h = jnp.einsum("oc,nci->noi", p["w1"], xf) * p["s1"][:, None] + p["b1"][:, None]
    y = jnp.einsum("oc,nci->noi", p["w2"], h) * p["s2"][:, None] + p["b2"][:, None]
    return y.reshape(N, C_OUT, H, W)


# --------------------------------------------------------------------------- #
if __name__ == "__main__":
    key = jax.random.PRNGKey(0)
    kx, kp = jax.random.split(key)

    raw = init_raw_params(kp)
    folded = fold_params(raw)

    # Small input consistent with the module (layer1 bottleneck: 64 channels).
    x = jax.random.normal(kx, (2, 64, 16, 16), jnp.float32)
    out = jax.block_until_ready(shallow_resnet_forward(x, folded))
    ref = reference_forward(x, raw)
    assert out.shape == (2, 256, 16, 16), out.shape
    assert out.dtype == jnp.bfloat16, out.dtype
    # bf16 operands + bf16 store -> relaxed tolerance vs f32 two-stage reference.
    assert jnp.allclose(out.astype(jnp.float32), ref, atol=3e-2, rtol=3e-2), float(
        jnp.max(jnp.abs(out.astype(jnp.float32) - ref)))

    # Ragged (non-128-multiple) spatial size, like real pysot 31x31 maps:
    # exercises the masked last tile of the cdiv grid.
    x2 = jax.random.normal(kx, (1, 64, 31, 31), jnp.float32)
    out2 = jax.block_until_ready(shallow_resnet_forward(x2, folded))
    ref2 = reference_forward(x2, raw)
    assert out2.shape == (1, 256, 31, 31), out2.shape
    assert jnp.allclose(out2.astype(jnp.float32), ref2, atol=3e-2, rtol=3e-2), float(
        jnp.max(jnp.abs(out2.astype(jnp.float32) - ref2)))

    print("KERNEL_OK")
</pallas_src>

<mosaic_0001>
module attributes {stable_mosaic.version = 11 : i64} {
  func.func @_fused_kernel(%arg0: i32, %arg1: i32, %arg2: memref<1x64x128xf32, #tpu.memory_space<vmem>>, %arg3: memref<256x64xbf16, #tpu.memory_space<vmem>>, %arg4: memref<256x1xf32, #tpu.memory_space<vmem>>, %arg5: memref<1x256x128xbf16, #tpu.memory_space<vmem>>) attributes {dimension_semantics = [#tpu.dimension_semantics<parallel>, #tpu.dimension_semantics<parallel>], iteration_bounds = array<i64: 2, 2>, scalar_prefetch = 0 : i64, scratch_operands = 0 : i64, tpu.core_type = #tpu.core_type<tc>, window_params = [{transform_indices = @transform_0, window_bounds = array<i64: 1, 64, 128>}, {pipeline_mode = #tpu.pipeline_mode<synchronous>, transform_indices = @transform_1, window_bounds = array<i64: 256, 64>}, {pipeline_mode = #tpu.pipeline_mode<synchronous>, transform_indices = @transform_2, window_bounds = array<i64: 256, 1>}, {transform_indices = @transform_3, window_bounds = array<i64: 1, 256, 128>}]} {
    %c0 = arith.constant 0 : index
    %c0_0 = arith.constant 0 : index
    %c0_1 = arith.constant 0 : index
    %0 = vector.load %arg2[%c0, %c0_0, %c0_1] : memref<1x64x128xf32, #tpu.memory_space<vmem>>, vector<1x64x128xf32>
    %1 = vector.shape_cast %0 : vector<1x64x128xf32> to vector<64x128xf32>
    %2 = arith.truncf %1 : vector<64x128xf32> to vector<64x128xbf16>
    %c0_2 = arith.constant 0 : index
    %c0_3 = arith.constant 0 : index
    %3 = vector.load %arg3[%c0_2, %c0_3] : memref<256x64xbf16, #tpu.memory_space<vmem>>, vector<256x64xbf16>
    %cst = arith.constant dense<0.000000e+00> : vector<256x128xf32>
    %4 = tpu.matmul %3, %2, %cst {dimension_numbers = #tpu.dot_dimension_numbers<[1], [0], [0], [1], [0, 0, 1, 1], [], []>} : vector<256x64xbf16>, vector<64x128xbf16>, vector<256x128xf32> -> vector<256x128xf32>
    %c0_4 = arith.constant 0 : index
    %c0_5 = arith.constant 0 : index
    %5 = vector.load %arg4[%c0_4, %c0_5] : memref<256x1xf32, #tpu.memory_space<vmem>>, vector<256x1xf32>
    %6 = vector.broadcast %5 : vector<256x1xf32> to vector<256x128xf32>
    %7 = arith.addf %4, %6 : vector<256x128xf32>
    %8 = arith.truncf %7 : vector<256x128xf32> to vector<256x128xbf16>
    %c0_6 = arith.constant 0 : index
    %c0_7 = arith.constant 0 : index
    %c0_8 = arith.constant 0 : index
    %9 = vector.load %arg5[%c0_6, %c0_7, %c0_8] : memref<1x256x128xbf16, #tpu.memory_space<vmem>>, vector<1x256x128xbf16>
    %10 = vector.shape_cast %9 : vector<1x256x128xbf16> to vector<256x128xbf16>
    %11 = vector.shape_cast %8 : vector<256x128xbf16> to vector<1x256x128xbf16>
    tpu.vector_store %arg5[%c0_6, %c0_7, %c0_8], %11 {strides = array<i32>} : memref<1x256x128xbf16, #tpu.memory_space<vmem>>, vector<1x256x128xbf16>,
    return
  }
  func.func @transform_0(%arg0: i32, %arg1: i32) -> (i32, i32, i32) {
    %c0_i32 = arith.constant 0 : i32
    %c0_i32_0 = arith.constant 0 : i32
    return %arg0, %c0_i32, %arg1 : i32, i32, i32
  }
  func.func @transform_1(%arg0: i32, %arg1: i32) -> (i32, i32) {
    %c0_i32 = arith.constant 0 : i32
    %c0_i32_0 = arith.constant 0 : i32
    %c0_i32_1 = arith.constant 0 : i32
    return %c0_i32, %c0_i32_0 : i32, i32
  }
  func.func @transform_2(%arg0: i32, %arg1: i32) -> (i32, i32) {
    %c0_i32 = arith.constant 0 : i32
    %c0_i32_0 = arith.constant 0 : i32
    %c0_i32_1 = arith.constant 0 : i32
    return %c0_i32, %c0_i32_0 : i32, i32
  }
  func.func @transform_3(%arg0: i32, %arg1: i32) -> (i32, i32, i32) {
    %c0_i32 = arith.constant 0 : i32
    %c0_i32_0 = arith.constant 0 : i32
    return %arg0, %c0_i32, %arg1 : i32, i32, i32
  }
}

</mosaic_0001>

<bundles_post_ra>
// kernel: tpu_custom_call.1
= control target key start
LH: loop header
LB: loop body
LE: loop exit
PB: predicated region body
PF: predicated region fallthrough
CT: control target
= control target key end

     0   :  { %8 = vsyncpa [#allocation4], 0  ;;  %s1885_s0 = inlined_call_operand.vmem [shape: f32[2,64,256], index: 0, kind: input, shape index: {}]   ;;  %s1886_s1 = inlined_call_operand.vmem [shape: bf16[256,64], index: 1, kind: input, shape index: {}]   ;;  %s1887_s2 = inlined_call_operand.vmem [shape: f32[256,1], index: 2, kind: input, shape index: {}]   ;;  %s1888_s3 = inlined_call_operand.hbm [shape: bf16[2,256,256], index: 3, kind: output, shape index: {}]  }
   0x1   :  { %10 = vsyncpa [#allocation4 + $0x1], 0  ;;  %s1522_s12 = smov 0   ;;  %s1524_s13 = smov 0  }
   0x2   :  { %s1526_s14 = smov 0   ;;  %s1528_s15 = smov 0  }
   0x3   :  { %s1530_s16 = smov 0   ;;  %s1532_s17 = smov 0  }
   0x4   :  { %s1534_s18 = smov 0   ;;  %s1536_s19 = smov 0  }
   0x5 LB: > { %s1034_s20 = sadd.s32 4294967295, %s1495_s19   ;;  %s1035_s21 = sadd.s32 4294967294, %s1495_s19   ;;  %s1495_s19 = sphi %s1536_s19, %s16_s19   ;;  %s1491_s18 = sphi %s1534_s18, %s1898_s18   ;;  %s1487_s17 = sphi %s1532_s17, %s1897_s17   ;;  %s1483_s16 = sphi %s1530_s16, %s1896_s16   ;;  %s1479_s15 = sphi %s1528_s15, %s1895_s15   ;;  %s1475_s14 = sphi %s1526_s14, %s1894_s14   ;;  %s1471_s13 = sphi %s1524_s13, %s1893_s13   ;;  %s1467_s12 = sphi %s1522_s12, %s1892_s12  }
   0x6   : > { %s25_s22 = sadd.s32 1, %s1487_s17  ;;  %s28_s23 = sadd.s32 1, %s1491_s18 }
   0x7   : > { %p26_p0 = scmp.ge.s32.totalorder %s25_s22, 2  ;;  %p44_p1 = scmp.ne.s32.totalorder %s1475_s14, %s1471_s13 }
   0x8   : > { %p45_p2 = scmp.eq.s32.totalorder %s1495_s19, 0  ;;  %p118_p5 = scmp.eq.s32.totalorder %s1034_s20, 3 }
   0x9   : > { %s1900_s22 = smov (%p26_p0, %s25_s22), 0  ;;  %s1902_s23 = smov (!%p26_p0, %s28_s23), %s1491_s18 }
   0xa   : > { %s33_s24 = ssub.s32 %s1487_s17, %s1900_s22  ;;  %p1574_p3 = por %p45_p2, %p44_p1 }
   0xb   : > { %p30_p4 = scmp.ge.s32.totalorder %s1902_s23, 2  ;;  %p123_p6 = scmp.ne.s32.totalorder %s1471_s13, %s1467_s12 }
   0xc   : > { %p124_p7 = scmp.eq.s32.totalorder %s1035_s21, 3  ;;  %p1582_p8 = por %p118_p5, %p44_p1 }
   0xd   : > { %s1904_s23 = smov (%p30_p4, %s1902_s23), 0  ;;  %s37_s30 = sadd.s32 1, %s1475_s14 }
   0xe   : > { %p1586_p9 = por %p124_p7, %p123_p6  ;;  %s32_s28 = ssub.s32 %s1491_s18, %s1904_s23 }
   0xf   : > { %s34_s29 = sor.u32 %s33_s24, %s32_s28  ;;  %p1037_p11 = scmp.ge.s32.totalorder %s1495_s19, 4 }
  0x10   : > { %p35_p10 = scmp.eq.s32.totalorder %s34_s29, 0 }
  0x11   : > { %146 = sbr.rel (%p1037_p11) target bundleno = 34 (0x22), region = 24 }
  0x12   : > { %s1594_s4 = scalar_select %p35_p10, %s1475_s14, %s37_s30  }
  0x18   : > { %149 = sbr.rel (!%p1574_p3) target bundleno = 34 (0x22), region = 28  ;;  %s151_s5 = sand.u32 (%p1574_p3), 1, %s1475_s14  }
  0x19   : > { %s1039_s6 = sshll.u32 (%p1574_p3), %s1491_s18, 4  ;;  %s1038_s7 = sshll.u32 (%p1574_p3), %s151_s5, 6 }
  0x1a   : > { %s155_s8 = sadd.s32 (%p1574_p3), %s1487_s17, %s1039_s6  ;;  %s153_s21 = scalar_lea.vmem (%p1574_p3), [#allocation2], %s1038_s7 }
  0x1b   : > { %s1040_s9 = sshll.u32 (%p1574_p3), %s155_s8, 3 }
  0x1c   : > { %s157_s20 = scalar_lea.vmem (%p1574_p3), %s1885_s0, %s1040_s9 }
  0x1d   : > { %v199_v0 = vld [vmem:[%s157_s20] sm:$0xff] (%p1574_p3)  ;;  %v201_v1 = vld [vmem:[%s157_s20 + $0x10] sm:$0xff] (%p1574_p3) }
  0x1e   : > { %v203_v2 = vld [vmem:[%s157_s20 + $0x20] sm:$0xff] (%p1574_p3)  ;;  %200 = vst [vmem:[%s153_s21] sm:$0xff] (%p1574_p3), %v199_v0  ;;  %202 = vst [vmem:[%s153_s21 + $0x8] sm:$0xff] (%p1574_p3), %v201_v1  ;;  %v205_v3 = vld [vmem:[%s157_s20 + $0x30] sm:$0xff] (%p1574_p3) }
  0x1f   : > { %204 = vst [vmem:[%s153_s21 + $0x10] sm:$0xff] %v203_v2  ;;  %v207_v4 = vld [vmem:[%s157_s20 + $0x40] sm:$0xff]  ;;  %v209_v5 = vld [vmem:[%s157_s20 + $0x50] sm:$0xff]  ;;  %206 = vst [vmem:[%s153_s21 + $0x18] sm:$0xff] %v205_v3 }
  0x20   : > { %208 = vst [vmem:[%s153_s21 + $0x20] sm:$0xff] %v207_v4  ;;  %210 = vst [vmem:[%s153_s21 + $0x28] sm:$0xff] %v209_v5  ;;  %v211_v6 = vld [vmem:[%s157_s20 + $0x60] sm:$0xff]  ;;  %v213_v7 = vld [vmem:[%s157_s20 + $0x70] sm:$0xff] }
  0x21   : > { %212 = vst [vmem:[%s153_s21 + $0x30] sm:$0xff] %v211_v6  ;;  %214 = vst [vmem:[%s153_s21 + $0x38] sm:$0xff] %v213_v7 }
  0x22 PF: > { %p1041_p12 = scmp.ge.s32.totalorder %s1495_s19, 1  ;;  %p219_p13 = scmp.lt.s32.totalorder %s1495_s19, 5 }
  0x24   : > { %p220_p0 = pnand %p1041_p12, %p219_p13 }
  0x25   : > { %s1608_s24 = sand.u32 (!%p220_p0), 1, %s1471_s13   ;;  %v296_v8 = vld [vmem:[%s1887_s2 + $0x10] sm:$0xff] (!%p220_p0)  ;;  %v294_v9 = vld [vmem:[%s1887_s2] sm:$0xff] (!%p220_p0)  ;;  %v1497_v10 = vmov (!%p220_p0), 0   ;;  %v297_v16 = vld [vmem:[%s1887_s2 + $0x18] sm:$0xff] (!%p220_p0)  ;;  %vm566_vm0 = vcmask (!%p220_p0), 523264  }
  0x26   : > { %223 = sbr.rel (%p220_p0) target bundleno = 318 (0x13e), region = 66  ;;  %s1042_s5 = sshll.u32 (!%p220_p0), %s1608_s24, 6  ;;  %1384 = vset.pattern.permute.xlu1 (!%p220_p0), %v1497_v10  ;;  %1383 = vset.pattern.permute.xlu0 (!%p220_p0), %v1497_v10  ;;  %v295_v17 = vld [vmem:[%s1887_s2 + $0x8] sm:$0xff] (!%p220_p0)  ;;  %v1385_v21 = vld [vmem:[%s1886_s1] sm:$0xff] (!%p220_p0)   ;;  %v301_v29 = vld [vmem:[%s1887_s2 + $0x38] sm:$0xff] (!%p220_p0) }
  0x27   : > { %338 = vperm.xlu1 (!%p220_p0), %1384, %v296_v8   ;;  %328 = vperm.xlu0 (!%p220_p0), %1383, %v294_v9   ;;  %s228_s6 = scalar_lea.vmem (!%p220_p0), [#allocation2], %s1042_s5  ;;  %v1386_v22 = vld [vmem:[%s1886_s1 + $0x40] sm:$0xff] (!%p220_p0)   ;;  %v299_v26 = vld [vmem:[%s1887_s2 + $0x28] sm:$0xff] (!%p220_p0)  ;;  %v300_v30 = vld [vmem:[%s1887_s2 + $0x30] sm:$0xff] (!%p220_p0)  ;;  %s1043_s8 = sshll.u32 (!%p220_p0), %s1608_s24, 7 }
  0x28   : > { %v250_v11 = vld [vmem:[%s228_s6] sm:$0xff] (!%p220_p0)  ;;  %v251_v12 = vld [vmem:[%s228_s6 + $0x8] sm:$0xff] (!%p220_p0)  ;;  %v252_v13 = vld [vmem:[%s228_s6 + $0x10] sm:$0xff] (!%p220_p0)  ;;  %1268 = vmatprep.mubr.msk.bf16.mxu0 (!%p220_p0), %vm566_vm0, %v1385_v21  ;;  %1284 = vmatprep.mubr.msk.bf16.mxu1 (!%p220_p0), %vm566_vm0, %v1386_v22  ;;  %s1794_s9 = scalar_lea.vmem (!%p220_p0), [#allocation3], %s1043_s8  ;;  %s1109_s10 = sshll.u32 (!%p220_p0), %s1483_s16, 6 }
  0x29   : > { %v258_v14 = vpack.c.bf16 (!%p220_p0), %v251_v12, %v250_v11  ;;  %v253_v15 = vld [vmem:[%s228_s6 + $0x18] sm:$0xff] (!%p220_p0)  ;;  %v254_v19 = vld [vmem:[%s228_s6 + $0x20] sm:$0xff] (!%p220_p0)  ;;  %v255_v20 = vld [vmem:[%s228_s6 + $0x28] sm:$0xff] (!%p220_p0)  ;;  %s948_s11 = sadd.s32 (!%p220_p0), %s1479_s15, %s1109_s10  ;;  %s951_s20 = sshll.u32 (!%p220_p0), %s1794_s9, 4  ;;  %s1827_s20 = int_to_ptr.vmem [resolvable:$true] %s951_s20 }
  0x2a   : > { %v259_v18 = vpack.c.bf16 (!%p220_p0), %v253_v15, %v252_v13  ;;  %v260_v23 = vpack.c.bf16 (!%p220_p0), %v255_v20, %v254_v19  ;;  %v256_v24 = vld [vmem:[%s228_s6 + $0x30] sm:$0xff] (!%p220_p0)  ;;  %v257_v25 = vld [vmem:[%s228_s6 + $0x38] sm:$0xff] (!%p220_p0)  ;;  %v298_v27 = vld [vmem:[%s1887_s2 + $0x20] sm:$0xff] (!%p220_p0)  ;;  %s1110_s16 = sshll.u32 (!%p220_p0), %s948_s11, 6  ;;  %s937_s28 = scalar_lea.sflag (!%p220_p0), [#allocation4], %s1608_s24 }
  0x2b   : > { %1260 = vmatprep.subr.bf16.mxu0 (!%p220_p0), %v258_v14  ;;  %1300 = vmatprep.subr.bf16.mxu1 (!%p220_p0), %v258_v14  ;;  %v261_v28 = vpack.c.bf16 (!%p220_p0), %v257_v25, %v256_v24  ;;  %v1387_v31 = vld [vmem:[%s1886_s1 + $0x8] sm:$0xff] (!%p220_p0)   ;;  %v302_v34 = vld [vmem:[%s1887_s2 + $0x40] sm:$0xff] (!%p220_p0)  ;;  %v1389_v35 = vld [vmem:[%s1886_s1 + $0x10] sm:$0xff] (!%p220_p0)   ;;  %s1825_s25 = scalar_lea.hbm (!%p220_p0), %s1888_s3, %s1110_s16  ;;  %s1401_s29 = scalar_lea.vmem (!%p220_p0), %s1827_s20, 2048 }
  0x2c   : > { %1261 = vmatpush3.bf16.msra.mxu0 (!%p220_p0), %v258_v14  ;;  %1304 = vmatpush3.bf16.msra.mxu1 (!%p220_p0), %v258_v14  ;;  %v1388_v32 = vld [vmem:[%s1886_s1 + $0x48] sm:$0xff] (!%p220_p0)   ;;  %v1390_v36 = vld [vmem:[%s1886_s1 + $0x50] sm:$0xff] (!%p220_p0)   ;;  %v305_v37 = vld [vmem:[%s1887_s2 + $0x58] sm:$0xff] (!%p220_p0)  ;;  %p1402_p1 = scmp.ne.s32.totalorder (!%p220_p0), %s1827_s20, %s1401_s29  ;;  %s1498_s30 = smov (!%p220_p0), [#allocation3]  }
  0x2d   : > { %1262 = vmatprep.subr.bf16.mxu0 %v259_v18  ;;  %1301 = vmatprep.subr.bf16.mxu1 %v259_v18  ;;  %v303_v33 = vld [vmem:[%s1887_s2 + $0x48] sm:$0xff]  ;;  %v304_v38 = vld [vmem:[%s1887_s2 + $0x50] sm:$0xff]  ;;  %v1391_v39 = vld [vmem:[%s1886_s1 + $0x18] sm:$0xff]   ;;  %s1405_s5 = sshll.u32 %s1498_s30, 4  ;;  %s1406_s5 = int_to_ptr.vmem [resolvable:$false] %s1405_s5 }
  0x2e   : > { %343 = vperm.xlu1 %1384, %v297_v16   ;;  %333 = vperm.xlu0 %1383, %v295_v17   ;;  %v1392_v40 = vld [vmem:[%s1886_s1 + $0x58] sm:$0xff]   ;;  %v307_v41 = vld [vmem:[%s1887_s2 + $0x68] sm:$0xff]  ;;  %v306_v42 = vld [vmem:[%s1887_s2 + $0x60] sm:$0xff]  ;;  %p1403_p2 = pnand %p1402_p1, %p1582_p8  ;;  %s1407_s6 = scalar_lea.vmem %s1406_s5, 4096 }
  0x2f   : > { %v1393_v43 = vld [vmem:[%s1886_s1 + $0x20] sm:$0xff]   ;;  %v309_v45 = vld [vmem:[%s1887_s2 + $0x78] sm:$0xff]  ;;  %v308_v46 = vld [vmem:[%s1887_s2 + $0x70] sm:$0xff]  ;;  %p1408_p4 = scmp.lt.s32.totalorder %s1827_s20, %s1406_s5  ;;  %p1409_p5 = scmp.lt.s32.totalorder %s1407_s6, %s1401_s29 }
  0x30   : > { %1263 = vmatpush3.bf16.msra.mxu0 %v259_v18  ;;  %1305 = vmatpush3.bf16.msra.mxu1 %v259_v18  ;;  %v1394_v44 = vld [vmem:[%s1886_s1 + $0x60] sm:$0xff]   ;;  %v1395_v47 = vld [vmem:[%s1886_s1 + $0x28] sm:$0xff]   ;;  %v1397_v51 = vld [vmem:[%s1886_s1 + $0x30] sm:$0xff]   ;;  %p1404_p3 = pneg %p1403_p2 }
  0x31   : > { %1264 = vmatprep.subr.bf16.mxu0 %v260_v23  ;;  %1302 = vmatprep.subr.bf16.mxu1 %v260_v23  ;;  %v1396_v48 = vld [vmem:[%s1886_s1 + $0x68] sm:$0xff]   ;;  %v310_v50 = vld [vmem:[%s1887_s2 + $0x80] sm:$0xff]  ;;  %v1398_v52 = vld [vmem:[%s1886_s1 + $0x70] sm:$0xff]   ;;  %p1410_p6 = por %p1409_p5, %p1408_p4 }
  0x32   : > { %353 = vperm.xlu1 %1384, %v299_v26   ;;  %348 = vperm.xlu0 %1383, %v298_v27   ;;  %v311_v49 = vld [vmem:[%s1887_s2 + $0x88] sm:$0xff]  ;;  %v313_v53 = vld [vmem:[%s1887_s2 + $0x98] sm:$0xff]  ;;  %v312_v54 = vld [vmem:[%s1887_s2 + $0x90] sm:$0xff] }
  0x33   : > { %v1399_v55 = vld [vmem:[%s1886_s1 + $0x38] sm:$0xff]   ;;  %v315_v57 = vld [vmem:[%s1887_s2 + $0xa8] sm:$0xff]  ;;  %v314_v58 = vld [vmem:[%s1887_s2 + $0xa0] sm:$0xff]  ;;  %p1411_p7 = pnand %p1410_p6, %p1404_p3 }
  0x34   : > { %1265 = vmatpush3.bf16.msra.mxu0 %v260_v23  ;;  %1306 = vmatpush3.bf16.msra.mxu1 %v260_v23  ;;  %v1400_v56 = vld [vmem:[%s1886_s1 + $0x78] sm:$0xff]   ;;  %v316_v60 = vld [vmem:[%s1887_s2 + $0xb0] sm:$0xff]  ;;  %v319_v61 = vld [vmem:[%s1887_s2 + $0xc8] sm:$0xff] }
  0x35   : > { %1266 = vmatprep.subr.bf16.mxu0 %v261_v28  ;;  %1303 = vmatprep.subr.bf16.mxu1 %v261_v28  ;;  %v317_v59 = vld [vmem:[%s1887_s2 + $0xb8] sm:$0xff]  ;;  %v318_v62 = vld [vmem:[%s1887_s2 + $0xc0] sm:$0xff]  ;;  %v320_v0 = vld [vmem:[%s1887_s2 + $0xd0] sm:$0xff] }
  0x36   : > { %363 = vperm.xlu1 %1384, %v301_v29   ;;  %358 = vperm.xlu0 %1383, %v300_v30   ;;  %v321_v63 = vld [vmem:[%s1887_s2 + $0xd8] sm:$0xff]  ;;  %v323_v1 = vld [vmem:[%s1887_s2 + $0xe8] sm:$0xff]  ;;  %v322_v2 = vld [vmem:[%s1887_s2 + $0xe0] sm:$0xff] }
  0x37   : > { %v325_v3 = vld [vmem:[%s1887_s2 + $0xf8] sm:$0xff]  ;;  %v324_v4 = vld [vmem:[%s1887_s2 + $0xf0] sm:$0xff] }
  0x38   : > { %1267 = vmatpush3.bf16.msra.mxu0 %v261_v28  ;;  %1307 = vmatpush3.bf16.msra.mxu1 %v261_v28 }
  0x3a   : > { %373 = vperm.xlu1 %1384, %v303_v33   ;;  %368 = vperm.xlu0 %1383, %v302_v34  }
  0x3b   : > { %1269 = vmatmul.mubr.msk.bf16.vlgmr.msra.gmra.mrb[0].mxu0 %vm566_vm0, %v1387_v31  ;;  %1285 = vmatmul.mubr.msk.bf16.vlgmr.msra.gmra.mrb[0].mxu1 %vm566_vm0, %v1388_v32 }
  0x3c   : > { %1272 = vmatprep.mubr.msk.bf16.mxu0 %vm566_vm0, %v1389_v35  ;;  %1288 = vmatprep.mubr.msk.bf16.mxu1 %vm566_vm0, %v1390_v36 }
  0x3e   : > { %383 = vperm.xlu1 %1384, %v305_v37   ;;  %378 = vperm.xlu0 %1383, %v304_v38  }
  0x42   : > { %393 = vperm.xlu1 %1384, %v307_v41   ;;  %388 = vperm.xlu0 %1383, %v306_v42  }
  0x43   : > { %1273 = vmatmul.mubr.msk.bf16.gmra.mrb[4].mxu0 %vm566_vm0, %v1391_v39  ;;  %1289 = vmatmul.mubr.msk.bf16.gmra.mrb[4].mxu1 %vm566_vm0, %v1392_v40 }
  0x44   : > { %1276 = vmatprep.mubr.msk.bf16.mxu0 %vm566_vm0, %v1393_v43  ;;  %1292 = vmatprep.mubr.msk.bf16.mxu1 %vm566_vm0, %v1394_v44 }
  0x46   : > { %403 = vperm.xlu1 %1384, %v309_v45   ;;  %398 = vperm.xlu0 %1383, %v308_v46  }
  0x4a   : > { %413 = vperm.xlu1 %1384, %v311_v49   ;;  %408 = vperm.xlu0 %1383, %v310_v50  }
  0x4b   : > { %1277 = vmatmul.mubr.msk.bf16.gmra.mrb[8].mxu0 %vm566_vm0, %v1395_v47  ;;  %1293 = vmatmul.mubr.msk.bf16.gmra.mrb[8].mxu1 %vm566_vm0, %v1396_v48 }
  0x4c   : > { %1280 = vmatprep.mubr.msk.bf16.mxu0 %vm566_vm0, %v1397_v51  ;;  %1296 = vmatprep.mubr.msk.bf16.mxu1 %vm566_vm0, %v1398_v52 }
  0x4e   : > { %423 = vperm.xlu1 %1384, %v313_v53   ;;  %418 = vperm.xlu0 %1383, %v312_v54  }
  0x52   : > { %433 = vperm.xlu1 %1384, %v315_v57   ;;  %428 = vperm.xlu0 %1383, %v314_v58  }
  0x53   : > { %1281 = vmatmul.mubr.msk.bf16.gmra.mrb[12].mxu0 %vm566_vm0, %v1399_v55  ;;  %1297 = vmatmul.mubr.msk.bf16.gmra.mrb[12].mxu1 %vm566_vm0, %v1400_v56 }
  0x56   : > { %443 = vperm.xlu1 %1384, %v317_v59   ;;  %438 = vperm.xlu0 %1383, %v316_v60  }
  0x5a   : > { %453 = vperm.xlu1 %1384, %v319_v61   ;;  %448 = vperm.xlu0 %1383, %v318_v62  }
  0x5e   : > { %463 = vperm.xlu1 %1384, %v321_v63   ;;  %458 = vperm.xlu0 %1383, %v320_v0  }
  0x62   : > { %473 = vperm.xlu1 %1384, %v323_v1   ;;  %468 = vperm.xlu0 %1383, %v322_v2  }
  0x66   : > { %483 = vperm.xlu1 %1384, %v325_v3   ;;  %478 = vperm.xlu0 %1383, %v324_v4  }
  0xa6   : > { %v339_v5 = vpop.permute.xlu1 %338  ;;  %v329_v6 = vpop.permute.xlu0 %328 }
  0xad   : > { %v344_v7 = vpop.permute.xlu1 %343  ;;  %v334_v8 = vpop.permute.xlu0 %333 }
  0xb1   : > { %v1771_v9 = vpop.permute.xlu1 %353  ;;  %v349_v10 = vpop.permute.xlu0 %348 }
  0xb5   : > { %v364_v11 = vpop.permute.xlu1 %363  ;;  %v359_v12 = vpop.permute.xlu0 %358 }
  0xb9   : > { %v1773_v13 = vpop.permute.xlu1 %373  ;;  %v1775_v14 = vpop.permute.xlu0 %368 }
  0xbd   : > { %v1777_v15 = vpop.permute.xlu1 %383  ;;  %v1779_v16 = vpop.permute.xlu0 %378 }
  0xc1   : > { %v1781_v17 = vpop.permute.xlu1 %393  ;;  %v1783_v18 = vpop.permute.xlu0 %388 }
  0xc5   : > { %v1785_v19 = vpop.permute.xlu1 %403  ;;  %v1787_v20 = vpop.permute.xlu0 %398 }
  0xc9   : > { %v414_v21 = vpop.permute.xlu1 %413  ;;  %v409_v22 = vpop.permute.xlu0 %408 }
  0xcd   : > { %v424_v23 = vpop.permute.xlu1 %423  ;;  %v419_v24 = vpop.permute.xlu0 %418 }
  0xd1   : > { %v434_v25 = vpop.permute.xlu1 %433  ;;  %v429_v26 = vpop.permute.xlu0 %428 }
  0xd5   : > { %v444_v27 = vpop.permute.xlu1 %443  ;;  %v439_v28 = vpop.permute.xlu0 %438 }
  0xd9   : > { %v1789_v29 = vpop.permute.xlu1 %453  ;;  %v1791_v30 = vpop.permute.xlu0 %448 }
  0xdd   : > { %v464_v51 = vpop.permute.xlu1 %463  ;;  %v459_v52 = vpop.permute.xlu0 %458 }
 0x10e   : > { %v1270_v31 = vpop.f32.mrb[0].mxu0  ;;  %v1286_v32 = vpop.f32.mrb[0].mxu1 }
 0x10f   : > { %v649_v33 = vpop.f32.mrb[1].mxu0  ;;  %v713_v34 = vpop.f32.mrb[1].mxu1  ;;  %v658_v37 = vadd.f32 %v1270_v31, %v339_v5  ;;  %v722_v38 = vadd.f32 %v1286_v32, %v419_v24 }
 0x110   : > { %v1271_v35 = vpop.f32.mrb[2].mxu0  ;;  %v1287_v36 = vpop.f32.mrb[2].mxu1  ;;  %v650_v43 = vadd.f32 %v649_v33, %v329_v6  ;;  %v714_v44 = vadd.f32 %v713_v34, %v409_v22 }
 0x111   : > { %v661_v39 = vadd.f32 %v1271_v35, %v344_v7  ;;  %v725_v40 = vadd.f32 %v1287_v36, %v424_v23  ;;  %v652_v41 = vpop.f32.mrb[3].mxu0  ;;  %v716_v42 = vpop.f32.mrb[3].mxu1 }
 0x112   : > { %v653_v45 = vadd.f32 %v652_v41, %v334_v8  ;;  %v717_v46 = vadd.f32 %v716_v42, %v414_v21  ;;  %v474_v21 = vpop.permute.xlu1 %473 }
 0x113   : > { %v1153_v47 = vpack.c.bf16 %v661_v39, %v658_v37  ;;  %v1193_v48 = vpack.c.bf16 %v725_v40, %v722_v38 }
 0x114   : > { %v1148_v49 = vpack.c.bf16 %v653_v45, %v650_v43  ;;  %v1188_v50 = vpack.c.bf16 %v717_v46, %v714_v44 }
 0x115   : > { %1225 = vst [vmem:[%s1794_s9 + $0x8] sm:$0xff] %v1153_v47   ;;  %1233 = vst [vmem:[%s1794_s9 + $0x48] sm:$0xff] %v1193_v48  }
 0x116   : > { %1149 = vst [vmem:[%s1794_s9] sm:$0xff] %v1148_v49   ;;  %1232 = vst [vmem:[%s1794_s9 + $0x40] sm:$0xff] %v1188_v50   ;;  %v1274_v53 = vpop.f32.mrb[4].mxu0  ;;  %v1290_v54 = vpop.f32.mrb[4].mxu1 }
 0x117   : > { %v665_v55 = vpop.f32.mrb[5].mxu0  ;;  %v729_v56 = vpop.f32.mrb[5].mxu1  ;;  %v674_v59 = vadd.f32 %v1274_v53, %v359_v12  ;;  %v738_v60 = vadd.f32 %v1290_v54, %v439_v28 }
 0x118   : > { %v1275_v57 = vpop.f32.mrb[6].mxu0  ;;  %v1291_v58 = vpop.f32.mrb[6].mxu1  ;;  %v666_v1 = vadd.f32 %v665_v55, %v349_v10  ;;  %v730_v2 = vadd.f32 %v729_v56, %v429_v26 }
 0x119   : > { %v677_v61 = vadd.f32 %v1275_v57, %v364_v11  ;;  %v741_v62 = vadd.f32 %v1291_v58, %v444_v27  ;;  %v668_v63 = vpop.f32.mrb[7].mxu0  ;;  %v732_v0 = vpop.f32.mrb[7].mxu1 }
 0x11a   : > { %v669_v3 = vadd.f32 %v668_v63, %v1771_v9  ;;  %v733_v4 = vadd.f32 %v732_v0, %v434_v25  ;;  %v469_v12 = vpop.permute.xlu0 %468  ;;  %v484_v39 = vpop.permute.xlu1 %483 }
 0x11b   : > { %v1163_v5 = vpack.c.bf16 %v677_v61, %v674_v59  ;;  %v1203_v6 = vpack.c.bf16 %v741_v62, %v738_v60 }
 0x11c   : > { %v1158_v7 = vpack.c.bf16 %v669_v3, %v666_v1  ;;  %v1198_v8 = vpack.c.bf16 %v733_v4, %v730_v2 }
 0x11d   : > { %1227 = vst [vmem:[%s1794_s9 + $0x18] sm:$0xff] %v1163_v5   ;;  %1235 = vst [vmem:[%s1794_s9 + $0x58] sm:$0xff] %v1203_v6  }
 0x11e   : > { %1226 = vst [vmem:[%s1794_s9 + $0x10] sm:$0xff] %v1158_v7   ;;  %1234 = vst [vmem:[%s1794_s9 + $0x50] sm:$0xff] %v1198_v8   ;;  %v1278_v11 = vpop.f32.mrb[8].mxu0  ;;  %v1294_v22 = vpop.f32.mrb[8].mxu1 }
 0x11f   : > { %v681_v23 = vpop.f32.mrb[9].mxu0  ;;  %v745_v24 = vpop.f32.mrb[9].mxu1  ;;  %v690_v9 = vadd.f32 %v1278_v11, %v1779_v16  ;;  %v754_v25 = vadd.f32 %v1294_v22, %v459_v52 }
 0x120   : > { %v1279_v10 = vpop.f32.mrb[10].mxu0  ;;  %v1295_v26 = vpop.f32.mrb[10].mxu1  ;;  %v682_v33 = vadd.f32 %v681_v23, %v1775_v14  ;;  %v746_v34 = vadd.f32 %v745_v24, %v1791_v30 }
 0x121   : > { %v693_v27 = vadd.f32 %v1279_v10, %v1777_v15  ;;  %v757_v28 = vadd.f32 %v1295_v26, %v464_v51  ;;  %v684_v31 = vpop.f32.mrb[11].mxu0  ;;  %v748_v32 = vpop.f32.mrb[11].mxu1 }
 0x122   : > { %v685_v35 = vadd.f32 %v684_v31, %v1773_v13  ;;  %v749_v36 = vadd.f32 %v748_v32, %v1789_v29  ;;  %v479_v40 = vpop.permute.xlu0 %478 }
 0x123   : > { %v1173_v16 = vpack.c.bf16 %v693_v27, %v690_v9  ;;  %v1213_v37 = vpack.c.bf16 %v757_v28, %v754_v25 }
 0x124   : > { %v1168_v38 = vpack.c.bf16 %v685_v35, %v682_v33  ;;  %v1208_v15 = vpack.c.bf16 %v749_v36, %v746_v34 }
 0x125   : > { %1229 = vst [vmem:[%s1794_s9 + $0x28] sm:$0xff] %v1173_v16   ;;  %1237 = vst [vmem:[%s1794_s9 + $0x68] sm:$0xff] %v1213_v37  }
 0x126   : > { %1228 = vst [vmem:[%s1794_s9 + $0x20] sm:$0xff] %v1168_v38   ;;  %1236 = vst [vmem:[%s1794_s9 + $0x60] sm:$0xff] %v1208_v15   ;;  %v1282_v41 = vpop.f32.mrb[12].mxu0  ;;  %v1298_v14 = vpop.f32.mrb[12].mxu1 }
 0x127   : > { %v697_v42 = vpop.f32.mrb[13].mxu0  ;;  %v761_v30 = vpop.f32.mrb[13].mxu1  ;;  %v706_v29 = vadd.f32 %v1282_v41, %v1787_v20  ;;  %v770_v44 = vadd.f32 %v1298_v14, %v479_v40 }
 0x128   : > { %v1283_v13 = vpop.f32.mrb[14].mxu0  ;;  %v1299_v43 = vpop.f32.mrb[14].mxu1  ;;  %v698_v49 = vadd.f32 %v697_v42, %v1783_v18  ;;  %v762_v50 = vadd.f32 %v761_v30, %v469_v12 }
 0x129   : > { %v709_v45 = vadd.f32 %v1283_v13, %v1785_v19  ;;  %v773_v46 = vadd.f32 %v1299_v43, %v484_v39  ;;  %v700_v47 = vpop.f32.mrb[15].mxu0  ;;  %v764_v48 = vpop.f32.mrb[15].mxu1 }
 0x12a   : > { %v701_v51 = vadd.f32 %v700_v47, %v1781_v17  ;;  %v765_v52 = vadd.f32 %v764_v48, %v474_v21 }
 0x12b   : > { %v1183_v20 = vpack.c.bf16 %v709_v45, %v706_v29  ;;  %v1223_v19 = vpack.c.bf16 %v773_v46, %v770_v44 }
 0x12c   : > { %v1178_v53 = vpack.c.bf16 %v701_v51, %v698_v49  ;;  %v1218_v54 = vpack.c.bf16 %v765_v52, %v762_v50 }
 0x12d   : > { %1231 = vst [vmem:[%s1794_s9 + $0x38] sm:$0xff] %v1183_v20   ;;  %1239 = vst [vmem:[%s1794_s9 + $0x78] sm:$0xff] %v1223_v19  }
 0x12e   : > { %1230 = vst [vmem:[%s1794_s9 + $0x30] sm:$0xff] %v1178_v53   ;;  %1238 = vst [vmem:[%s1794_s9 + $0x70] sm:$0xff] %v1218_v54  }
 0x12f   : > { %1414 = shalt.err (!%p1411_p7)
}
 0x130   : > { %s1415_s7 = scalar_lea.hbm %s1825_s25, 2048  ;;  %s1419_s10 = scalar_lea.hbm %s1888_s3, 8192 }
 0x131   : > { %p1416_p10 = scmp.ne.s32.totalorder %s1825_s25, %s1415_s7  ;;  %p1420_p13 = scmp.lt.u32.totalorder %s1825_s25, %s1888_s3 }
 0x132   : > { %p1421_p0 = scmp.lt.u32.totalorder %s1419_s10, %s1415_s7  ;;  %p1423_p2 = scmp.lt.u32.totalorder %s1415_s7, %s1825_s25 }
 0x133   : > { %p1417_p11 = pnand %p1416_p10, %p1582_p8 }
 0x134   : > { %p1422_p1 = por %p1421_p0, %p1420_p13 }
 0x135   : > { %p1418_p12 = pneg %p1417_p11 }
 0x136   : > { %p1424_p3 = por %p1423_p2, %p1422_p1 }
 0x138   : > { %p1425_p4 = pnand %p1424_p3, %p1418_p12 }
 0x13a   : > { %1428 = shalt.err (!%p1425_p4)
}
 0x13b   : > { %s1499_s15 = smov 64   ;;  %s1500_s21 = smov 128  }
 0x13c   : > { %s1501_s29 = smov 4  }
 0x13d   : > { %1308 = dma.vmem_to_hbm [thread:$0]  (%p1582_p8), %s1827_s20, 2048, %s1825_s25, %s937_s28, %s1499_s15, %s1500_s21, %s1501_s29  }
 0x13e PF: > { %p1314_p5 = scmp.ge.s32.totalorder %s1495_s19, 2  ;;  %s966_s30 = sand.u32 1, %s1467_s12  }
 0x13f   : > { %s967_s5 = scalar_lea.sflag [#allocation4], %s966_s30 }
 0x140   : > { %p1311_p6 = pnand %p1314_p5, %p1586_p9 }
 0x142   : > { %1462 = dma.done.wait (!%p1311_p6), %s967_s5, 2048  }
 0x143   : > { %1464 = vsyncadd (!%p1311_p6), %s967_s5, 4294965248  ;;  %s16_s19 = sadd.s32 1, %s1495_s19   ;;  %s1892_s12 = smov %s1471_s13 }
 0x144   : > { %p13_p7 = scmp.ge.s32.totalorder %s16_s19, 6   ;;  %s1893_s13 = smov %s1475_s14 }
 0x145   : > { %s1894_s14 = smov %s1594_s4  ;;  %s1895_s15 = smov %s1487_s17 }
 0x146   : > { %s1896_s16 = smov %s1491_s18  ;;  %s1897_s17 = smov %s1900_s22 }
 0x147   : > { %s1898_s18 = smov %s1904_s23  ;;  %15 = sbr.rel (!%p13_p7) target bundleno = 5 (0x5), region = 110 }
 0x14e   :  { %972 = vsyncpa [#allocation4], 1 }
 0x14f   :  { %974 = vsyncpa [#allocation4 + $0x1], 1 }

</bundles_post_ra>
